<compile_context>
chip_gen: v7x
topology: tpu7x:2x2x1
jax: 0.10.0
libtpu: 0.0.40
codegen_flags: <defaults>
</compile_context>

<pallas_src>
import functools

import jax
import jax.numpy as jnp
from jax.experimental import pallas as pl
from jax.experimental.pallas import tpu as pltpu


def _round_up(x, m):
    return ((x + m - 1) // m) * m


def _outblock_kernel(x_ref, w_ref, b_ref, o_ref, *, matmul_dtype):
    # x_ref: (C_in, S_TILE)      voxels on the lane axis (dense vregs / dense vst)
    # w_ref: (n_classes, C_in)   VMEM-resident (constant index_map)
    # b_ref: (n_classes, 1)      f32 bias, per-sublane broadcast
    # o_ref: (n_classes, S_TILE)
    x = x_ref[...].astype(matmul_dtype)          # no-op when dtypes already match
    w = w_ref[...].astype(matmul_dtype)
    acc = jnp.dot(w, x, preferred_element_type=jnp.float32)   # f32 accumulate
    o_ref[...] = (acc + b_ref[...]).astype(o_ref.dtype)       # bias add in f32


_VMEM_LIMIT_BYTES = 32 * 1024 * 1024  # above v5e's 16 MiB scoped default


@functools.lru_cache(maxsize=1)
def _vmem_tile_budget_bytes():
    # The HBM-roofline plateau is reached by ~2-4 MiB tiles; larger tiles buy no
    # bandwidth.  Shrink the budget on v7x, which has only 64 MiB VMEM per TC.
    try:
        info = pltpu.get_tpu_info()
        vmem = getattr(info, "vmem_capacity_bytes", None)
        if vmem is not None and vmem <= 64 * 1024 * 1024:
            return 10 * 1024 * 1024        # v7x
    except Exception:                       # best-effort query; fall through
        pass
    return 16 * 1024 * 1024                 # v5e / v6e (128 MiB physical)


def _choose_spatial_tile(dhw, n_batch, c_in, n_classes, in_itemsize, out_itemsize,
                         budget_bytes, max_tile_voxels):
    """Pick (s_tile, num_s_tiles) for the voxel axis."""
    if dhw <= 128:
        return dhw, 1                        # full-extent block is always legal

    rows_in = _round_up(c_in, 8)             # sublane-padded rows (real footprint)
    rows_out = _round_up(n_classes, 8)
    # Double-buffered streaming blocks (in + out).
    bytes_per_voxel = 2 * (rows_in * in_itemsize + rows_out * out_itemsize)
    # Resident weight + bias buffers (also double-buffered; upper-bound at f32).
    resident = 2 * (rows_out * _round_up(c_in, 128) + rows_out * 128) * 4
    avail = max(budget_bytes - resident, 128 * bytes_per_voxel)
    s_max = max(128, (avail // bytes_per_voxel) // 128 * 128)
    if max_tile_voxels is not None:
        s_max = min(s_max, max(128, (max_tile_voxels // 128) * 128))

    num_tiles = pl.cdiv(dhw, s_max)
    # v7x has 2 TensorCores: guarantee >= 2 parallel grid steps so neither idles.
    # (Costs at most one extra ~0.35 us grid step on single-TC v5e/v6e.)
    if n_batch * num_tiles < 2:
        num_tiles = max(num_tiles, 2)
    if num_tiles == 1:
        return dhw, 1
    # Split as evenly as possible (multiple of 128) to avoid a tiny ragged tail
    # block (short DMA + masked vst.msk writeback).
    s_tile = _round_up(pl.cdiv(dhw, num_tiles), 128)
    num_tiles = pl.cdiv(dhw, s_tile)
    if num_tiles == 1:
        return dhw, 1
    return s_tile, num_tiles


@functools.partial(
    jax.jit, static_argnames=("out_dtype", "matmul_dtype", "max_tile_voxels")
)
def outblock_forward(x, weight, bias, *, out_dtype=None, matmul_dtype=None,
                     max_tile_voxels=None):
    """OutBlock.forward: 1x1x1 Conv3d.

    x:      (N, C_in, D, H, W)
    weight: (n_classes, C_in, 1, 1, 1)   (PyTorch Conv3d layout)
    bias:   (n_classes,)
    out_dtype:    output dtype (default: x.dtype)
    matmul_dtype: dtype of the MXU operands (default: x.dtype).  Pass
                  jnp.bfloat16 to skip f32 MXU emulation on v6e/v7x; f32
                  accumulation and the f32 bias add are kept either way.
    returns (N, n_classes, D, H, W)
    """
    N, C_in, D, H, W = x.shape
    n_classes = weight.shape[0]
    dhw = D * H * W

    out_dtype = jnp.dtype(x.dtype if out_dtype is None else out_dtype)
    matmul_dtype = jnp.dtype(x.dtype if matmul_dtype is None else matmul_dtype)

    # Free reshapes only — no transposes, no extra HBM passes.
    x_flat = x.reshape(N, C_in, dhw)
    w_mat = weight.reshape(n_classes, C_in)
    b_col = bias.astype(jnp.float32).reshape(n_classes, 1)

    s_tile, num_s_tiles = _choose_spatial_tile(
        dhw, N, C_in, n_classes,
        jnp.dtype(x.dtype).itemsize, out_dtype.itemsize,
        _vmem_tile_budget_bytes(), max_tile_voxels)

    kernel = functools.partial(_outblock_kernel, matmul_dtype=matmul_dtype)

    out_flat = pl.pallas_call(
        kernel,
        out_shape=jax.ShapeDtypeStruct((N, n_classes, dhw), out_dtype),
        grid_spec=pltpu.PrefetchScalarGridSpec(
            num_scalar_prefetch=0,
            grid=(N, num_s_tiles),
            in_specs=[
                pl.BlockSpec((None, C_in, s_tile), lambda n, s: (n, 0, s)),
                pl.BlockSpec((n_classes, C_in), lambda n, s: (0, 0)),
                pl.BlockSpec((n_classes, 1), lambda n, s: (0, 0)),
            ],
            out_specs=pl.BlockSpec((None, n_classes, s_tile), lambda n, s: (n, 0, s)),
        ),
        compiler_params=pltpu.CompilerParams(
            dimension_semantics=("parallel", "parallel"),
            vmem_limit_bytes=_VMEM_LIMIT_BYTES,
        ),
    )(x_flat, w_mat, b_col)

    return out_flat.reshape(N, n_classes, D, H, W)


def _reference(x, weight, bias):
    n_classes, c_in = weight.shape[0], weight.shape[1]
    return (
        jnp.einsum("ncdhw,kc->nkdhw", x, weight.reshape(n_classes, c_in))
        + bias[None, :, None, None, None]
    )


if __name__ == "__main__":
    key = jax.random.PRNGKey(0)
    k_x, k_w, k_b, k_x2, k_x3 = jax.random.split(key, 5)

    # OutBlock(in_channels=8, n_classes=4) on a small 3D volume.
    N, C_in, n_classes = 2, 8, 4
    D = H = W = 8
    x = jax.random.normal(k_x, (N, C_in, D, H, W), dtype=jnp.float32)
    weight = jax.random.normal(k_w, (n_classes, C_in, 1, 1, 1), dtype=jnp.float32) * 0.1
    bias = jax.random.normal(k_b, (n_classes,), dtype=jnp.float32) * 0.1

    # 1) f32 path — exact module semantics.
    out = jax.block_until_ready(outblock_forward(x, weight, bias))
    assert out.shape == (N, n_classes, D, H, W)
    assert jnp.allclose(out, _reference(x, weight, bias), atol=1e-4, rtol=1e-4)

    # 2) Ragged spatial extent + forced small tile: exercises the cdiv grid, the
    #    even-split tile selection, and the masked tail-block path.
    x2 = jax.random.normal(k_x2, (N, C_in, 5, 7, 9), dtype=jnp.float32)
    out2 = jax.block_until_ready(
        outblock_forward(x2, weight, bias, max_tile_voxels=128)
    )
    assert out2.shape == (N, n_classes, 5, 7, 9)
    assert jnp.allclose(out2, _reference(x2, weight, bias), atol=1e-4, rtol=1e-4)

    # 3) N=1: the voxel axis is forced to split into >=2 grid steps so both v7x
    #    TensorCores get work (harmless on single-TC v5e/v6e).
    x3 = jax.random.normal(k_x3, (1, C_in, D, H, W), dtype=jnp.float32)
    out3 = jax.block_until_ready(outblock_forward(x3, weight, bias))
    assert jnp.allclose(out3, _reference(x3, weight, bias), atol=1e-4, rtol=1e-4)

    # 4) Opt-in bf16 MXU operands (f32 accumulate + f32 bias add): keeps compute
    #    hidden under DMA on v6e/v7x.
    out4 = jax.block_until_ready(
        outblock_forward(x, weight, bias, matmul_dtype=jnp.bfloat16)
    )
    assert jnp.allclose(out4, _reference(x, weight, bias), atol=3e-2, rtol=3e-2)

    # 5) Opt-in bf16 I/O (~2x on this bandwidth-bound op when upstream is bf16).
    xb = x.astype(jnp.bfloat16)
    wb = weight.astype(jnp.bfloat16)
    out5 = jax.block_until_ready(outblock_forward(xb, wb, bias))
    assert out5.dtype == jnp.bfloat16
    ref5 = _reference(xb.astype(jnp.float32), wb.astype(jnp.float32), bias)
    assert jnp.allclose(out5.astype(jnp.float32), ref5, atol=5e-2, rtol=5e-2)

    print("KERNEL_OK")
</pallas_src>

<mosaic_0001>
module attributes {stable_mosaic.version = 11 : i64} {
  func.func @_outblock_kernel(%arg0: i32, %arg1: i32, %arg2: memref<1x8x512xf32, #tpu.memory_space<vmem>>, %arg3: memref<4x8xf32, #tpu.memory_space<vmem>>, %arg4: memref<4x1xf32, #tpu.memory_space<vmem>>, %arg5: memref<1x4x512xf32, #tpu.memory_space<vmem>>) attributes {dimension_semantics = [#tpu.dimension_semantics<parallel>, #tpu.dimension_semantics<parallel>], iteration_bounds = array<i64: 2, 1>, scalar_prefetch = 0 : i64, scratch_operands = 0 : i64, tpu.core_type = #tpu.core_type<tc>, window_params = [{transform_indices = @transform_0, window_bounds = array<i64: 1, 8, 512>}, {pipeline_mode = #tpu.pipeline_mode<synchronous>, transform_indices = @transform_1, window_bounds = array<i64: 4, 8>}, {pipeline_mode = #tpu.pipeline_mode<synchronous>, transform_indices = @transform_2, window_bounds = array<i64: 4, 1>}, {transform_indices = @transform_3, window_bounds = array<i64: 1, 4, 512>}]} {
    %c0 = arith.constant 0 : index
    %c0_0 = arith.constant 0 : index
    %c0_1 = arith.constant 0 : index
    %0 = vector.load %arg2[%c0, %c0_0, %c0_1] : memref<1x8x512xf32, #tpu.memory_space<vmem>>, vector<1x8x512xf32>
    %1 = vector.shape_cast %0 : vector<1x8x512xf32> to vector<8x512xf32>
    %c0_2 = arith.constant 0 : index
    %c0_3 = arith.constant 0 : index
    %2 = vector.load %arg3[%c0_2, %c0_3] : memref<4x8xf32, #tpu.memory_space<vmem>>, vector<4x8xf32>
    %cst = arith.constant dense<0.000000e+00> : vector<4x512xf32>
    %3 = tpu.matmul %2, %1, %cst {dimension_numbers = #tpu.dot_dimension_numbers<[1], [0], [0], [1], [0, 0, 1, 1], [], []>} : vector<4x8xf32>, vector<8x512xf32>, vector<4x512xf32> -> vector<4x512xf32>
    %c0_4 = arith.constant 0 : index
    %c0_5 = arith.constant 0 : index
    %4 = vector.load %arg4[%c0_4, %c0_5] : memref<4x1xf32, #tpu.memory_space<vmem>>, vector<4x1xf32>
    %5 = vector.broadcast %4 : vector<4x1xf32> to vector<4x512xf32>
    %6 = arith.addf %3, %5 : vector<4x512xf32>
    %c0_6 = arith.constant 0 : index
    %c0_7 = arith.constant 0 : index
    %c0_8 = arith.constant 0 : index
    %7 = vector.load %arg5[%c0_6, %c0_7, %c0_8] : memref<1x4x512xf32, #tpu.memory_space<vmem>>, vector<1x4x512xf32>
    %8 = vector.shape_cast %7 : vector<1x4x512xf32> to vector<4x512xf32>
    %9 = vector.shape_cast %6 : vector<4x512xf32> to vector<1x4x512xf32>
    tpu.vector_store %arg5[%c0_6, %c0_7, %c0_8], %9 {strides = array<i32>} : memref<1x4x512xf32, #tpu.memory_space<vmem>>, vector<1x4x512xf32>,
    return
  }
  func.func @transform_0(%arg0: i32, %arg1: i32) -> (i32, i32, i32) {
    %c0_i32 = arith.constant 0 : i32
    %c0_i32_0 = arith.constant 0 : i32
    return %arg0, %c0_i32, %arg1 : i32, i32, i32
  }
  func.func @transform_1(%arg0: i32, %arg1: i32) -> (i32, i32) {
    %c0_i32 = arith.constant 0 : i32
    %c0_i32_0 = arith.constant 0 : i32
    %c0_i32_1 = arith.constant 0 : i32
    return %c0_i32, %c0_i32_0 : i32, i32
  }
  func.func @transform_2(%arg0: i32, %arg1: i32) -> (i32, i32) {
    %c0_i32 = arith.constant 0 : i32
    %c0_i32_0 = arith.constant 0 : i32
    %c0_i32_1 = arith.constant 0 : i32
    return %c0_i32, %c0_i32_0 : i32, i32
  }
  func.func @transform_3(%arg0: i32, %arg1: i32) -> (i32, i32, i32) {
    %c0_i32 = arith.constant 0 : i32
    %c0_i32_0 = arith.constant 0 : i32
    return %arg0, %c0_i32, %arg1 : i32, i32, i32
  }
}

</mosaic_0001>

<bundles_post_ra>
// kernel: outblock_forward.1
= control target key start
LH: loop header
LB: loop body
LE: loop exit
PB: predicated region body
PF: predicated region fallthrough
CT: control target
= control target key end

     0   :  { %s552_s12 = smov 0   ;;  %s554_s13 = smov 0   ;;  %s595_s0 = inlined_call_operand.vmem [shape: f32[2,8,512], index: 0, kind: input, shape index: {}]   ;;  %s596_s1 = inlined_call_operand.vmem [shape: f32[4,8], index: 1, kind: input, shape index: {}]   ;;  %s597_s2 = inlined_call_operand.vmem [shape: f32[4,1], index: 2, kind: input, shape index: {}]   ;;  %s598_s3 = inlined_call_operand.vmem [shape: f32[2,4,512], index: 3, kind: output, shape index: {}]  }
   0x1   :  { %s556_s14 = smov 0  }
   0x2 LB: > { %s25_s15 = sadd.s32 1, %s524_s13  ;;  %p468_p0 = scmp.ge.s32.totalorder %s528_s14, 1  ;;  %s528_s14 = sphi %s556_s14, %s13_s14   ;;  %s524_s13 = sphi %s554_s13, %s600_s13   ;;  %s520_s12 = sphi %s552_s12, %s599_s12  }
   0x3   : > { %p27_p1 = scmp.ge.s32.totalorder %s25_s15, 2  ;;  %p158_p2 = scmp.lt.s32.totalorder %s528_s14, 3 }
   0x5   : > { %s602_s15 = smov (%p27_p1, %s25_s15), 0  ;;  %p159_p3 = pnand %p468_p0, %p158_p2 }
   0x6   : > { %p191_p4 = scmp.lt.s32.totalorder (!%p159_p3), %s520_s12, 1  ;;  %v530_v0 = vmov (!%p159_p3), 0.0   ;;  %v215_v1 = vld [vmem:[%s597_s2] sm:$0xf] (!%p159_p3)  ;;  %v531_v2 = vmov (!%p159_p3), 0   ;;  %vm221_vm0 = vcmask (!%p159_p3), 64512  }
   0x7   : > { %162 = sbr.rel (%p159_p3) target bundleno = 238 (0xee), region = 32  ;;  %289 = vmatprep.mubr.f32.mxu0 (!%p159_p3), %v530_v0  ;;  %360 = vmatprep.mubr.f32.mxu1 (!%p159_p3), %v530_v0  ;;  %v214_v3 = vld [vmem:[%s596_s1] sm:$0xf] (!%p159_p3) }
   0x8   : > { %505 = vset.pattern.permute.xlu0 (!%p159_p3), %v531_v2 }
   0x9   : > { %218 = vperm.xlu0 (!%p159_p3), %505, %v215_v1  }
   0xe   : > { %s604_s12 = smov (!%p191_p4, %s520_s12), 1 }
   0xf   : > { %s477_s18 = sshll.u32 %s604_s12, 5  ;;  %s478_s24 = sshll.u32 %s604_s12, 4 }
  0x10   : > { %s198_s21 = scalar_lea.vmem %s595_s0, %s477_s18  ;;  %s208_s27 = scalar_lea.vmem %s598_s3, %s478_s24 }
  0x11   : > { %v211_v4 = vld [vmem:[%s198_s21 + $0x8] sm:$0xff]  ;;  %v213_v5 = vld [vmem:[%s198_s21 + $0x18] sm:$0xff]  ;;  %v210_v6 = vld [vmem:[%s198_s21] sm:$0xff] }
  0x12   : > { %225 = vmatprep.subr.mxu0 %v211_v4  ;;  %296 = vmatprep.subr.mxu1 %v213_v5  ;;  %v212_v7 = vld [vmem:[%s198_s21 + $0x10] sm:$0xff] }
  0x13   : > { %226 = vmatpush1.msra.mxu0 %v210_v6  ;;  %297 = vmatpush1.msra.mxu1 %v212_v7 }
  0x14   : > { %473 = vmatmul.mubr.msk.f32.vlgmr.msra.gmra.mrb[0].mxu0 %vm221_vm0, %v214_v3  ;;  %474 = vmatmul.mubr.msk.f32.vlgmr.msra.gmra.mrb[0].mxu1 %vm221_vm0, %v214_v3 }
  0x88   : > { %v219_v8 = vpop.permute.xlu0 %218 }
  0xe7   : > { %v291_v9 = vpop.f32.mrb[0].mxu0  ;;  %v362_v10 = vpop.f32.mrb[0].mxu1 }
  0xe8   : > { %v292_v11 = vadd.f32 %v291_v9, %v219_v8  ;;  %v363_v12 = vadd.f32 %v362_v10, %v219_v8  ;;  %v293_v13 = vpop.f32.mrb[1].mxu0  ;;  %v364_v14 = vpop.f32.mrb[1].mxu1 }
  0xe9   : > { %v294_v15 = vadd.f32 %v293_v13, %v219_v8  ;;  %v365_v16 = vadd.f32 %v364_v14, %v219_v8 }
  0xeb   : > { %v371_v17 = vcombine.low %v292_v11, %v294_v15  ;;  %v372_v18 = vcombine.low %v363_v12, %v365_v16 }
  0xed   : > { %375 = vst [vmem:[%s208_s27] sm:$0xff] %v371_v17  ;;  %376 = vst [vmem:[%s208_s27 + $0x8] sm:$0xff] %v372_v18 }
  0xee PF: > { %s13_s14 = sadd.s32 1, %s528_s14   ;;  %s599_s12 = smov %s524_s13 }
  0xef   : > { %p10_p5 = scmp.ge.s32.totalorder %s13_s14, 4   ;;  %s600_s13 = smov %s602_s15 }
  0xf1   :  { %12 = sbr.rel (!%p10_p5) target bundleno = 2 (0x2), region = 62 }

</bundles_post_ra>
